<compile_context>
chip_gen: v7x
topology: tpu7x:2x2x1
jax: 0.10.0
libtpu: 0.0.40
codegen_flags: <defaults>
</compile_context>

<pallas_src>
import functools

import jax
import jax.numpy as jnp
from jax.experimental import pallas as pl


def lstm_kernel(x_ref, w_ih_ref, w_hh_ref, b_ref, w_out_ref, b_out_ref,
                out_ref, *, seq_len, batch, hidden):
    """Single-shot LSTM + Linear kernel (whole problem resident in VMEM).

    x_ref     : (S*B, I)  f32   time-major input, flattened over (seq, batch)
    w_ih_ref  : (I, 4H)   bf16  input->gates weights (pre-transposed)
    w_hh_ref  : (H, 4H)   bf16  hidden->gates weights (pre-transposed)
    b_ref     : (1, 4H)   f32   b_ih + b_hh
    w_out_ref : (H, O)    bf16  final Linear weight (pre-transposed)
    b_out_ref : (1, O)    f32   final Linear bias
    out_ref   : (B, O)    f32   output
    """
    S, B, H = seq_len, batch, hidden

    # ---- Phase 1: hoisted input projection for ALL time steps — one bf16 MXU
    # call, f32 accumulation.  Kept as a value (no VMEM scratch round-trip).
    xp = jnp.dot(x_ref[...].astype(jnp.bfloat16), w_ih_ref[...],
                 preferred_element_type=jnp.float32) + b_ref[...]   # (S*B, 4H)

    # ---- Phase 2: serial recurrence.  W_hh hoisted once -> stays in vregs
    # across every step; h/c carries and gate math stay f32.
    w_hh = w_hh_ref[...]                                   # (H, 4H) bf16
    lane = jax.lax.broadcasted_iota(jnp.int32, (B, 4 * H), 1)
    g_mask = (lane >= 2 * H) & (lane < 3 * H)              # tanh block selector

    def step(x_proj_t, h, c):
        # (B, 4H) pre-activations: hoisted input part + recurrent MXU part.
        gates = x_proj_t + jnp.dot(h.astype(jnp.bfloat16), w_hh,
                                   preferred_element_type=jnp.float32)
        # Full-vreg nonlinearities on the EUP; g-block uses tanh, rest sigmoid.
        act = jnp.where(g_mask, jnp.tanh(gates), jax.nn.sigmoid(gates))
        i_g = act[:, 0 * H:1 * H]
        f_g = act[:, 1 * H:2 * H]
        g_g = act[:, 2 * H:3 * H]
        o_g = act[:, 3 * H:4 * H]
        c_new = f_g * c + i_g * g_g
        h_new = o_g * jnp.tanh(c_new)
        return h_new, c_new

    h = jnp.zeros((B, H), jnp.float32)
    c = jnp.zeros((B, H), jnp.float32)

    if S <= 32:
        # Fully unrolled: static (one-vreg) slices of xp, full LLO visibility.
        for t in range(S):
            h, c = step(xp[t * B:(t + 1) * B, :], h, c)
    else:
        # Partial unroll keeps scheduler visibility while bounding code size.
        # TODO(synk): for very long sequences stage xp in a VMEM scratch and add
        # a batch-tile "parallel" grid axis (v7x megacore) with explicit
        # vmem_limit_bytes sized for v7x's 64 MiB VMEM.
        def body(t, carry):
            h, c = carry
            xpt = jax.lax.dynamic_slice(xp, (t * B, 0), (B, 4 * H))
            return step(xpt, h, c)
        h, c = jax.lax.fori_loop(0, S, body, (h, c), unroll=8)

    # ---- Phase 3: fused final Linear on the last hidden state.
    # TODO(synk): O=22 lanes -> masked store; pad to 128 if this ever gets tiled.
    out_ref[...] = (jnp.dot(h.astype(jnp.bfloat16), w_out_ref[...],
                            preferred_element_type=jnp.float32)
                    + b_out_ref[...]).astype(out_ref.dtype)


def prepare_params(w_ih, w_hh, b_ih, b_hh, w_lin, b_lin):
    """One-time parameter prep OUTSIDE the per-call hot path: transposes,
    bias fusion, bf16 casts.  The jitted forward does no layout work."""
    return dict(
        w_ih_t=jnp.asarray(w_ih.T, jnp.bfloat16),              # (I, 4H)
        w_hh_t=jnp.asarray(w_hh.T, jnp.bfloat16),               # (H, 4H)
        b=(b_ih + b_hh).astype(jnp.float32).reshape(1, -1),     # (1, 4H)
        w_lin_t=jnp.asarray(w_lin.T, jnp.bfloat16),             # (H, O)
        b_lin=b_lin.astype(jnp.float32).reshape(1, -1),         # (1, O)
    )


@jax.jit
def lstm_model_forward(x, params):
    """x: (seq, batch, input_size), time-major (batch_first=False).
    Returns linear(h_T) of shape (batch, 22)."""
    S, B, I = x.shape
    H = params["w_hh_t"].shape[0]
    O = params["w_lin_t"].shape[1]

    # Metadata-only reshape (valid because x is time-major / contiguous).
    x2d = x.reshape(S * B, I)

    kernel = functools.partial(lstm_kernel, seq_len=S, batch=B, hidden=H)

    # No grid: single invocation, everything resident in VMEM (tens of KiB).
    return pl.pallas_call(
        kernel,
        out_shape=jax.ShapeDtypeStruct((B, O), jnp.float32),
    )(x2d, params["w_ih_t"], params["w_hh_t"], params["b"],
      params["w_lin_t"], params["b_lin"])


def reference_forward(x, w_ih, w_hh, b_ih, b_hh, w_lin, b_lin, hidden_size):
    """Pure-JAX f32 reference of the PyTorch forward (sanity check)."""
    S, B, _ = x.shape
    H = hidden_size
    h = jnp.zeros((B, H), jnp.float32)
    c = jnp.zeros((B, H), jnp.float32)
    for t in range(S):
        gates = x[t] @ w_ih.T + b_ih + h @ w_hh.T + b_hh
        i = jax.nn.sigmoid(gates[:, 0 * H:1 * H])
        f = jax.nn.sigmoid(gates[:, 1 * H:2 * H])
        g = jnp.tanh(gates[:, 2 * H:3 * H])
        o = jax.nn.sigmoid(gates[:, 3 * H:4 * H])
        c = f * c + i * g
        h = o * jnp.tanh(c)
    return h @ w_lin.T + b_lin


if __name__ == "__main__":
    # Small shapes consistent with the module (batch_first=False => time-major).
    SEQ, BATCH, INPUT_SIZE, HIDDEN = 8, 8, 16, 32
    OUT_DIM = 22

    key = jax.random.PRNGKey(0)
    ks = jax.random.split(key, 7)
    bound = 1.0 / jnp.sqrt(HIDDEN)

    # Deterministic parameter init (same shapes as nn.LSTM / nn.Linear).
    w_ih = jax.random.uniform(ks[0], (4 * HIDDEN, INPUT_SIZE), jnp.float32, -bound, bound)
    w_hh = jax.random.uniform(ks[1], (4 * HIDDEN, HIDDEN), jnp.float32, -bound, bound)
    b_ih = jax.random.uniform(ks[2], (4 * HIDDEN,), jnp.float32, -bound, bound)
    b_hh = jax.random.uniform(ks[3], (4 * HIDDEN,), jnp.float32, -bound, bound)
    w_lin = jax.random.uniform(ks[4], (OUT_DIM, HIDDEN), jnp.float32, -bound, bound)
    b_lin = jax.random.uniform(ks[5], (OUT_DIM,), jnp.float32, -bound, bound)

    x = jax.random.normal(ks[6], (SEQ, BATCH, INPUT_SIZE), jnp.float32)

    # One-time parameter preparation (outside the jitted hot path).
    params = prepare_params(w_ih, w_hh, b_ih, b_hh, w_lin, b_lin)

    out = lstm_model_forward(x, params)
    out = jax.block_until_ready(out)

    ref = reference_forward(x, w_ih, w_hh, b_ih, b_hh, w_lin, b_lin, HIDDEN)
    assert out.shape == (BATCH, OUT_DIM)
    # bf16 MXU operands (f32 accumulation + f32 carries) => loosened tolerance
    # vs. the pure-f32 reference.
    assert jnp.allclose(out, ref, atol=3e-2, rtol=3e-2), "mismatch vs reference"

    print("KERNEL_OK")
</pallas_src>

<mosaic_0001>
module attributes {stable_mosaic.version = 11 : i64} {
  func.func @lstm_kernel(%arg0: memref<64x16xf32, #tpu.memory_space<vmem>>, %arg1: memref<16x128xbf16, #tpu.memory_space<vmem>>, %arg2: memref<32x128xbf16, #tpu.memory_space<vmem>>, %arg3: memref<1x128xf32, #tpu.memory_space<vmem>>, %arg4: memref<32x22xbf16, #tpu.memory_space<vmem>>, %arg5: memref<1x22xf32, #tpu.memory_space<vmem>>, %arg6: memref<8x22xf32, #tpu.memory_space<vmem>>) attributes {dimension_semantics = [], scalar_prefetch = 0 : i64, scratch_operands = 0 : i64, tpu.core_type = #tpu.core_type<tc>} {
    %c0 = arith.constant 0 : index
    %c0_0 = arith.constant 0 : index
    %0 = vector.load %arg0[%c0, %c0_0] : memref<64x16xf32, #tpu.memory_space<vmem>>, vector<64x16xf32>
    %1 = arith.truncf %0 : vector<64x16xf32> to vector<64x16xbf16>
    %c0_1 = arith.constant 0 : index
    %c0_2 = arith.constant 0 : index
    %2 = vector.load %arg1[%c0_1, %c0_2] : memref<16x128xbf16, #tpu.memory_space<vmem>>, vector<16x128xbf16>
    %cst = arith.constant dense<0.000000e+00> : vector<64x128xf32>
    %3 = tpu.matmul %1, %2, %cst {dimension_numbers = #tpu.dot_dimension_numbers<[1], [0], [0], [1], [0, 0, 1, 1], [], []>} : vector<64x16xbf16>, vector<16x128xbf16>, vector<64x128xf32> -> vector<64x128xf32>
    %c0_3 = arith.constant 0 : index
    %c0_4 = arith.constant 0 : index
    %4 = vector.load %arg3[%c0_3, %c0_4] : memref<1x128xf32, #tpu.memory_space<vmem>>, vector<1x128xf32>
    %5 = vector.broadcast %4 : vector<1x128xf32> to vector<64x128xf32>
    %6 = arith.addf %3, %5 : vector<64x128xf32>
    %c0_5 = arith.constant 0 : index
    %c0_6 = arith.constant 0 : index
    %7 = vector.load %arg2[%c0_5, %c0_6] : memref<32x128xbf16, #tpu.memory_space<vmem>>, vector<32x128xbf16>
    %8 = tpu.iota {dimensions = array<i32: 1>} : vector<8x128xi32>
    %c64_i32 = arith.constant 64 : i32
    %9 = vector.broadcast %c64_i32 : i32 to vector<8x128xi32>
    %10 = arith.cmpi sge, %8, %9 : vector<8x128xi32>
    %c96_i32 = arith.constant 96 : i32
    %11 = vector.broadcast %c96_i32 : i32 to vector<8x128xi32>
    %12 = arith.cmpi slt, %8, %11 : vector<8x128xi32>
    %13 = arith.andi %10, %12 : vector<8x128xi1>
    %cst_7 = arith.constant 0.000000e+00 : f32
    %14 = vector.broadcast %cst_7 : f32 to vector<8x32xf32>
    %cst_8 = arith.constant 0.000000e+00 : f32
    %15 = vector.broadcast %cst_8 : f32 to vector<8x32xf32>
    %16 = vector.extract_strided_slice %6 {offsets = [0, 0], sizes = [8, 128], strides = [1, 1]} : vector<64x128xf32> to vector<8x128xf32>
    %17 = arith.truncf %14 : vector<8x32xf32> to vector<8x32xbf16>
    %cst_9 = arith.constant dense<0.000000e+00> : vector<8x128xf32>
    %18 = tpu.matmul %17, %7, %cst_9 {dimension_numbers = #tpu.dot_dimension_numbers<[1], [0], [0], [1], [0, 0, 1, 1], [], []>} : vector<8x32xbf16>, vector<32x128xbf16>, vector<8x128xf32> -> vector<8x128xf32>
    %19 = arith.addf %16, %18 : vector<8x128xf32>
    %20 = math.tanh %19 : vector<8x128xf32>
    %21 = arith.negf %19 : vector<8x128xf32>
    %22 = math.exp %21 : vector<8x128xf32>
    %cst_10 = arith.constant 1.000000e+00 : f32
    %23 = vector.broadcast %cst_10 : f32 to vector<8x128xf32>
    %24 = arith.addf %23, %22 : vector<8x128xf32>
    %25 = arith.divf %23, %24 : vector<8x128xf32>
    %26 = arith.select %13, %20, %25 : vector<8x128xi1>, vector<8x128xf32>
    %27 = vector.extract_strided_slice %26 {offsets = [0, 0], sizes = [8, 32], strides = [1, 1]} : vector<8x128xf32> to vector<8x32xf32>
    %28 = vector.extract_strided_slice %26 {offsets = [0, 32], sizes = [8, 32], strides = [1, 1]} : vector<8x128xf32> to vector<8x32xf32>
    %29 = vector.extract_strided_slice %26 {offsets = [0, 64], sizes = [8, 32], strides = [1, 1]} : vector<8x128xf32> to vector<8x32xf32>
    %30 = vector.extract_strided_slice %26 {offsets = [0, 96], sizes = [8, 32], strides = [1, 1]} : vector<8x128xf32> to vector<8x32xf32>
    %31 = arith.mulf %28, %15 : vector<8x32xf32>
    %32 = arith.mulf %27, %29 : vector<8x32xf32>
    %33 = arith.addf %31, %32 : vector<8x32xf32>
    %34 = math.tanh %33 : vector<8x32xf32>
    %35 = arith.mulf %30, %34 : vector<8x32xf32>
    %36 = vector.extract_strided_slice %6 {offsets = [8, 0], sizes = [8, 128], strides = [1, 1]} : vector<64x128xf32> to vector<8x128xf32>
    %37 = arith.truncf %35 : vector<8x32xf32> to vector<8x32xbf16>
    %cst_11 = arith.constant dense<0.000000e+00> : vector<8x128xf32>
    %38 = tpu.matmul %37, %7, %cst_11 {dimension_numbers = #tpu.dot_dimension_numbers<[1], [0], [0], [1], [0, 0, 1, 1], [], []>} : vector<8x32xbf16>, vector<32x128xbf16>, vector<8x128xf32> -> vector<8x128xf32>
    %39 = arith.addf %36, %38 : vector<8x128xf32>
    %40 = math.tanh %39 : vector<8x128xf32>
    %41 = arith.negf %39 : vector<8x128xf32>
    %42 = math.exp %41 : vector<8x128xf32>
    %cst_12 = arith.constant 1.000000e+00 : f32
    %43 = vector.broadcast %cst_12 : f32 to vector<8x128xf32>
    %44 = arith.addf %43, %42 : vector<8x128xf32>
    %45 = arith.divf %43, %44 : vector<8x128xf32>
    %46 = arith.select %13, %40, %45 : vector<8x128xi1>, vector<8x128xf32>
    %47 = vector.extract_strided_slice %46 {offsets = [0, 0], sizes = [8, 32], strides = [1, 1]} : vector<8x128xf32> to vector<8x32xf32>
    %48 = vector.extract_strided_slice %46 {offsets = [0, 32], sizes = [8, 32], strides = [1, 1]} : vector<8x128xf32> to vector<8x32xf32>
    %49 = vector.extract_strided_slice %46 {offsets = [0, 64], sizes = [8, 32], strides = [1, 1]} : vector<8x128xf32> to vector<8x32xf32>
    %50 = vector.extract_strided_slice %46 {offsets = [0, 96], sizes = [8, 32], strides = [1, 1]} : vector<8x128xf32> to vector<8x32xf32>
    %51 = arith.mulf %48, %33 : vector<8x32xf32>
    %52 = arith.mulf %47, %49 : vector<8x32xf32>
    %53 = arith.addf %51, %52 : vector<8x32xf32>
    %54 = math.tanh %53 : vector<8x32xf32>
    %55 = arith.mulf %50, %54 : vector<8x32xf32>
    %56 = vector.extract_strided_slice %6 {offsets = [16, 0], sizes = [8, 128], strides = [1, 1]} : vector<64x128xf32> to vector<8x128xf32>
    %57 = arith.truncf %55 : vector<8x32xf32> to vector<8x32xbf16>
    %cst_13 = arith.constant dense<0.000000e+00> : vector<8x128xf32>
    %58 = tpu.matmul %57, %7, %cst_13 {dimension_numbers = #tpu.dot_dimension_numbers<[1], [0], [0], [1], [0, 0, 1, 1], [], []>} : vector<8x32xbf16>, vector<32x128xbf16>, vector<8x128xf32> -> vector<8x128xf32>
    %59 = arith.addf %56, %58 : vector<8x128xf32>
    %60 = math.tanh %59 : vector<8x128xf32>
    %61 = arith.negf %59 : vector<8x128xf32>
    %62 = math.exp %61 : vector<8x128xf32>
    %cst_14 = arith.constant 1.000000e+00 : f32
    %63 = vector.broadcast %cst_14 : f32 to vector<8x128xf32>
    %64 = arith.addf %63, %62 : vector<8x128xf32>
    %65 = arith.divf %63, %64 : vector<8x128xf32>
    %66 = arith.select %13, %60, %65 : vector<8x128xi1>, vector<8x128xf32>
    %67 = vector.extract_strided_slice %66 {offsets = [0, 0], sizes = [8, 32], strides = [1, 1]} : vector<8x128xf32> to vector<8x32xf32>
    %68 = vector.extract_strided_slice %66 {offsets = [0, 32], sizes = [8, 32], strides = [1, 1]} : vector<8x128xf32> to vector<8x32xf32>
    %69 = vector.extract_strided_slice %66 {offsets = [0, 64], sizes = [8, 32], strides = [1, 1]} : vector<8x128xf32> to vector<8x32xf32>
    %70 = vector.extract_strided_slice %66 {offsets = [0, 96], sizes = [8, 32], strides = [1, 1]} : vector<8x128xf32> to vector<8x32xf32>
    %71 = arith.mulf %68, %53 : vector<8x32xf32>
    %72 = arith.mulf %67, %69 : vector<8x32xf32>
    %73 = arith.addf %71, %72 : vector<8x32xf32>
    %74 = math.tanh %73 : vector<8x32xf32>
    %75 = arith.mulf %70, %74 : vector<8x32xf32>
    %76 = vector.extract_strided_slice %6 {offsets = [24, 0], sizes = [8, 128], strides = [1, 1]} : vector<64x128xf32> to vector<8x128xf32>
    %77 = arith.truncf %75 : vector<8x32xf32> to vector<8x32xbf16>
    %cst_15 = arith.constant dense<0.000000e+00> : vector<8x128xf32>
    %78 = tpu.matmul %77, %7, %cst_15 {dimension_numbers = #tpu.dot_dimension_numbers<[1], [0], [0], [1], [0, 0, 1, 1], [], []>} : vector<8x32xbf16>, vector<32x128xbf16>, vector<8x128xf32> -> vector<8x128xf32>
    %79 = arith.addf %76, %78 : vector<8x128xf32>
    %80 = math.tanh %79 : vector<8x128xf32>
    %81 = arith.negf %79 : vector<8x128xf32>
    %82 = math.exp %81 : vector<8x128xf32>
    %cst_16 = arith.constant 1.000000e+00 : f32
    %83 = vector.broadcast %cst_16 : f32 to vector<8x128xf32>
    %84 = arith.addf %83, %82 : vector<8x128xf32>
    %85 = arith.divf %83, %84 : vector<8x128xf32>
    %86 = arith.select %13, %80, %85 : vector<8x128xi1>, vector<8x128xf32>
    %87 = vector.extract_strided_slice %86 {offsets = [0, 0], sizes = [8, 32], strides = [1, 1]} : vector<8x128xf32> to vector<8x32xf32>
    %88 = vector.extract_strided_slice %86 {offsets = [0, 32], sizes = [8, 32], strides = [1, 1]} : vector<8x128xf32> to vector<8x32xf32>
    %89 = vector.extract_strided_slice %86 {offsets = [0, 64], sizes = [8, 32], strides = [1, 1]} : vector<8x128xf32> to vector<8x32xf32>
    %90 = vector.extract_strided_slice %86 {offsets = [0, 96], sizes = [8, 32], strides = [1, 1]} : vector<8x128xf32> to vector<8x32xf32>
    %91 = arith.mulf %88, %73 : vector<8x32xf32>
    %92 = arith.mulf %87, %89 : vector<8x32xf32>
    %93 = arith.addf %91, %92 : vector<8x32xf32>
    %94 = math.tanh %93 : vector<8x32xf32>
    %95 = arith.mulf %90, %94 : vector<8x32xf32>
    %96 = vector.extract_strided_slice %6 {offsets = [32, 0], sizes = [8, 128], strides = [1, 1]} : vector<64x128xf32> to vector<8x128xf32>
    %97 = arith.truncf %95 : vector<8x32xf32> to vector<8x32xbf16>
    %cst_17 = arith.constant dense<0.000000e+00> : vector<8x128xf32>
    %98 = tpu.matmul %97, %7, %cst_17 {dimension_numbers = #tpu.dot_dimension_numbers<[1], [0], [0], [1], [0, 0, 1, 1], [], []>} : vector<8x32xbf16>, vector<32x128xbf16>, vector<8x128xf32> -> vector<8x128xf32>
    %99 = arith.addf %96, %98 : vector<8x128xf32>
    %100 = math.tanh %99 : vector<8x128xf32>
    %101 = arith.negf %99 : vector<8x128xf32>
    %102 = math.exp %101 : vector<8x128xf32>
    %cst_18 = arith.constant 1.000000e+00 : f32
    %103 = vector.broadcast %cst_18 : f32 to vector<8x128xf32>
    %104 = arith.addf %103, %102 : vector<8x128xf32>
    %105 = arith.divf %103, %104 : vector<8x128xf32>
    %106 = arith.select %13, %100, %105 : vector<8x128xi1>, vector<8x128xf32>
    %107 = vector.extract_strided_slice %106 {offsets = [0, 0], sizes = [8, 32], strides = [1, 1]} : vector<8x128xf32> to vector<8x32xf32>
    %108 = vector.extract_strided_slice %106 {offsets = [0, 32], sizes = [8, 32], strides = [1, 1]} : vector<8x128xf32> to vector<8x32xf32>
    %109 = vector.extract_strided_slice %106 {offsets = [0, 64], sizes = [8, 32], strides = [1, 1]} : vector<8x128xf32> to vector<8x32xf32>
    %110 = vector.extract_strided_slice %106 {offsets = [0, 96], sizes = [8, 32], strides = [1, 1]} : vector<8x128xf32> to vector<8x32xf32>
    %111 = arith.mulf %108, %93 : vector<8x32xf32>
    %112 = arith.mulf %107, %109 : vector<8x32xf32>
    %113 = arith.addf %111, %112 : vector<8x32xf32>
    %114 = math.tanh %113 : vector<8x32xf32>
    %115 = arith.mulf %110, %114 : vector<8x32xf32>
    %116 = vector.extract_strided_slice %6 {offsets = [40, 0], sizes = [8, 128], strides = [1, 1]} : vector<64x128xf32> to vector<8x128xf32>
    %117 = arith.truncf %115 : vector<8x32xf32> to vector<8x32xbf16>
    %cst_19 = arith.constant dense<0.000000e+00> : vector<8x128xf32>
    %118 = tpu.matmul %117, %7, %cst_19 {dimension_numbers = #tpu.dot_dimension_numbers<[1], [0], [0], [1], [0, 0, 1, 1], [], []>} : vector<8x32xbf16>, vector<32x128xbf16>, vector<8x128xf32> -> vector<8x128xf32>
    %119 = arith.addf %116, %118 : vector<8x128xf32>
    %120 = math.tanh %119 : vector<8x128xf32>
    %121 = arith.negf %119 : vector<8x128xf32>
    %122 = math.exp %121 : vector<8x128xf32>
    %cst_20 = arith.constant 1.000000e+00 : f32
    %123 = vector.broadcast %cst_20 : f32 to vector<8x128xf32>
    %124 = arith.addf %123, %122 : vector<8x128xf32>
    %125 = arith.divf %123, %124 : vector<8x128xf32>
    %126 = arith.select %13, %120, %125 : vector<8x128xi1>, vector<8x128xf32>
    %127 = vector.extract_strided_slice %126 {offsets = [0, 0], sizes = [8, 32], strides = [1, 1]} : vector<8x128xf32> to vector<8x32xf32>
    %128 = vector.extract_strided_slice %126 {offsets = [0, 32], sizes = [8, 32], strides = [1, 1]} : vector<8x128xf32> to vector<8x32xf32>
    %129 = vector.extract_strided_slice %126 {offsets = [0, 64], sizes = [8, 32], strides = [1, 1]} : vector<8x128xf32> to vector<8x32xf32>
    %130 = vector.extract_strided_slice %126 {offsets = [0, 96], sizes = [8, 32], strides = [1, 1]} : vector<8x128xf32> to vector<8x32xf32>
    %131 = arith.mulf %128, %113 : vector<8x32xf32>
    %132 = arith.mulf %127, %129 : vector<8x32xf32>
    %133 = arith.addf %131, %132 : vector<8x32xf32>
    %134 = math.tanh %133 : vector<8x32xf32>
    %135 = arith.mulf %130, %134 : vector<8x32xf32>
    %136 = vector.extract_strided_slice %6 {offsets = [48, 0], sizes = [8, 128], strides = [1, 1]} : vector<64x128xf32> to vector<8x128xf32>
    %137 = arith.truncf %135 : vector<8x32xf32> to vector<8x32xbf16>
    %cst_21 = arith.constant dense<0.000000e+00> : vector<8x128xf32>
    %138 = tpu.matmul %137, %7, %cst_21 {dimension_numbers = #tpu.dot_dimension_numbers<[1], [0], [0], [1], [0, 0, 1, 1], [], []>} : vector<8x32xbf16>, vector<32x128xbf16>, vector<8x128xf32> -> vector<8x128xf32>
    %139 = arith.addf %136, %138 : vector<8x128xf32>
    %140 = math.tanh %139 : vector<8x128xf32>
    %141 = arith.negf %139 : vector<8x128xf32>
    %142 = math.exp %141 : vector<8x128xf32>
    %cst_22 = arith.constant 1.000000e+00 : f32
    %143 = vector.broadcast %cst_22 : f32 to vector<8x128xf32>
    %144 = arith.addf %143, %142 : vector<8x128xf32>
    %145 = arith.divf %143, %144 : vector<8x128xf32>
    %146 = arith.select %13, %140, %145 : vector<8x128xi1>, vector<8x128xf32>
    %147 = vector.extract_strided_slice %146 {offsets = [0, 0], sizes = [8, 32], strides = [1, 1]} : vector<8x128xf32> to vector<8x32xf32>
    %148 = vector.extract_strided_slice %146 {offsets = [0, 32], sizes = [8, 32], strides = [1, 1]} : vector<8x128xf32> to vector<8x32xf32>
    %149 = vector.extract_strided_slice %146 {offsets = [0, 64], sizes = [8, 32], strides = [1, 1]} : vector<8x128xf32> to vector<8x32xf32>
    %150 = vector.extract_strided_slice %146 {offsets = [0, 96], sizes = [8, 32], strides = [1, 1]} : vector<8x128xf32> to vector<8x32xf32>
    %151 = arith.mulf %148, %133 : vector<8x32xf32>
    %152 = arith.mulf %147, %149 : vector<8x32xf32>
    %153 = arith.addf %151, %152 : vector<8x32xf32>
    %154 = math.tanh %153 : vector<8x32xf32>
    %155 = arith.mulf %150, %154 : vector<8x32xf32>
    %156 = vector.extract_strided_slice %6 {offsets = [56, 0], sizes = [8, 128], strides = [1, 1]} : vector<64x128xf32> to vector<8x128xf32>
    %157 = arith.truncf %155 : vector<8x32xf32> to vector<8x32xbf16>
    %cst_23 = arith.constant dense<0.000000e+00> : vector<8x128xf32>
    %158 = tpu.matmul %157, %7, %cst_23 {dimension_numbers = #tpu.dot_dimension_numbers<[1], [0], [0], [1], [0, 0, 1, 1], [], []>} : vector<8x32xbf16>, vector<32x128xbf16>, vector<8x128xf32> -> vector<8x128xf32>
    %159 = arith.addf %156, %158 : vector<8x128xf32>
    %160 = math.tanh %159 : vector<8x128xf32>
    %161 = arith.negf %159 : vector<8x128xf32>
    %162 = math.exp %161 : vector<8x128xf32>
    %cst_24 = arith.constant 1.000000e+00 : f32
    %163 = vector.broadcast %cst_24 : f32 to vector<8x128xf32>
    %164 = arith.addf %163, %162 : vector<8x128xf32>
    %165 = arith.divf %163, %164 : vector<8x128xf32>
    %166 = arith.select %13, %160, %165 : vector<8x128xi1>, vector<8x128xf32>
    %167 = vector.extract_strided_slice %166 {offsets = [0, 0], sizes = [8, 32], strides = [1, 1]} : vector<8x128xf32> to vector<8x32xf32>
    %168 = vector.extract_strided_slice %166 {offsets = [0, 32], sizes = [8, 32], strides = [1, 1]} : vector<8x128xf32> to vector<8x32xf32>
    %169 = vector.extract_strided_slice %166 {offsets = [0, 64], sizes = [8, 32], strides = [1, 1]} : vector<8x128xf32> to vector<8x32xf32>
    %170 = vector.extract_strided_slice %166 {offsets = [0, 96], sizes = [8, 32], strides = [1, 1]} : vector<8x128xf32> to vector<8x32xf32>
    %171 = arith.mulf %168, %153 : vector<8x32xf32>
    %172 = arith.mulf %167, %169 : vector<8x32xf32>
    %173 = arith.addf %171, %172 : vector<8x32xf32>
    %174 = math.tanh %173 : vector<8x32xf32>
    %175 = arith.mulf %170, %174 : vector<8x32xf32>
    %176 = arith.truncf %175 : vector<8x32xf32> to vector<8x32xbf16>
    %c0_25 = arith.constant 0 : index
    %c0_26 = arith.constant 0 : index
    %177 = vector.load %arg4[%c0_25, %c0_26] : memref<32x22xbf16, #tpu.memory_space<vmem>>, vector<32x22xbf16>
    %cst_27 = arith.constant dense<0.000000e+00> : vector<8x22xf32>
    %178 = tpu.matmul %176, %177, %cst_27 {dimension_numbers = #tpu.dot_dimension_numbers<[1], [0], [0], [1], [0, 0, 1, 1], [], []>} : vector<8x32xbf16>, vector<32x22xbf16>, vector<8x22xf32> -> vector<8x22xf32>
    %c0_28 = arith.constant 0 : index
    %c0_29 = arith.constant 0 : index
    %179 = vector.load %arg5[%c0_28, %c0_29] : memref<1x22xf32, #tpu.memory_space<vmem>>, vector<1x22xf32>
    %180 = vector.broadcast %179 : vector<1x22xf32> to vector<8x22xf32>
    %181 = arith.addf %178, %180 : vector<8x22xf32>
    %c0_30 = arith.constant 0 : index
    %c0_31 = arith.constant 0 : index
    %182 = vector.load %arg6[%c0_30, %c0_31] : memref<8x22xf32, #tpu.memory_space<vmem>>, vector<8x22xf32>
    tpu.vector_store %arg6[%c0_30, %c0_31], %181 {strides = array<i32>} : memref<8x22xf32, #tpu.memory_space<vmem>>, vector<8x22xf32>,
    return
  }
}

</mosaic_0001>

<bundles_post_ra>
// kernel: lstm_model_forward.1
= control target key start
LH: loop header
LB: loop body
LE: loop exit
PB: predicated region body
PF: predicated region fallthrough
CT: control target
= control target key end

     0   :  { %11 = vsyncpa [#allocation3], 0  ;;  %s1337_s0 = inlined_call_operand.hbm [shape: f32[64,16], index: 0, kind: input, shape index: {}]   ;;  %s1338_s1 = inlined_call_operand.vmem [shape: bf16[16,128], index: 1, kind: input, shape index: {}]   ;;  %s1339_s2 = inlined_call_operand.vmem [shape: bf16[32,128], index: 2, kind: input, shape index: {}]   ;;  %s1340_s3 = inlined_call_operand.vmem [shape: f32[1,128], index: 3, kind: input, shape index: {}]   ;;  %s1341_s4 = inlined_call_operand.vmem [shape: bf16[32,22], index: 4, kind: input, shape index: {}]   ;;  %s1342_s5 = inlined_call_operand.vmem [shape: f32[1,22], index: 5, kind: input, shape index: {}]   ;;  %s1343_s6 = inlined_call_operand.hbm [shape: f32[8,22], index: 6, kind: output, shape index: {}]  }
   0x1   :  { %12 = vsyncpa [#allocation4], 0  ;;  %s1100_s21 = smov [#allocation2]   ;;  %s1052_s25 = scalar_lea.hbm %s1337_s0, 1024 }
   0x2   :  { %s18_s22 = sshll.u32 %s1100_s21, 4  ;;  %p1053_p0 = scmp.ne.s32.totalorder %s1337_s0, %s1052_s25  ;;  %s19_s22 = int_to_ptr.vmem [resolvable:$true] %s18_s22 }
   0x3   :  { %p1056_p1 = scmp.lt.u32.totalorder %s1052_s25, %s1337_s0 }
   0x5   :  { %p1058_p2 = pnand %p1056_p1, %p1053_p0 }
   0x7   :  { %1061 = shalt.err (!%p1058_p2)
}
   0x8   :  { %s1062_s30 = scalar_lea.vmem %s19_s22, 1024  ;;  %p1067_p4 = scmp.lt.s32.totalorder %s19_s22, %s19_s22 }
   0x9   :  { %p1063_p3 = scmp.ne.s32.totalorder %s19_s22, %s1062_s30  ;;  %p1068_p5 = scmp.lt.s32.totalorder %s1062_s30, %s1062_s30 }
   0xb   :  { %p1069_p6 = por %p1068_p5, %p1067_p4 }
   0xd   :  { %p1070_p7 = pnand %p1069_p6, %p1063_p3 }
   0xf   :  { %1073 = shalt.err (!%p1070_p7)
}
  0x10   :  { %s1101_s7 = smov 128   ;;  %s1102_s8 = smov 8  }
  0x11   :  { %24 = dma.hbm_to_vmem [thread:$0]  %s1337_s0, 1024, %s19_s22, [#allocation3], %s1101_s7, %s1101_s7, %s1102_s8  }
  0x12   :  { %1096 = dma.done.wait [#allocation3], 1024  }
  0x13   :  { %1097 = vsyncadd [#allocation3], 4294966272  ;;  %v1103_v0 = vmov 0.0   ;;  %vm1104_vm0 = vmmov 0   ;;  %v983_v1 = vld [vmem:[%s1338_s1] sm:$0xff]   ;;  %v40_v4 = vld [vmem:[#allocation2 + $0x8] sm:$0xff]  ;;  %v148_v24 = vlaneseq }
  0x14   :  { %902 = vmatprep.subr.bf16.mxu1 %v1103_v0  ;;  %906 = vmatprep.mubr.msk.bf16.mxu1 %vm1104_vm0, %v1103_v0  ;;  %v1165_v2 = vld [vmem:[%s1339_s2] sm:$0xff]   ;;  %vm66_vm1 = vcmask 130048   ;;  %v41_v5 = vld [vmem:[#allocation2 + $0x10] sm:$0xff]  ;;  %v42_v7 = vld [vmem:[#allocation2 + $0x18] sm:$0xff]  ;;  %v1105_v10 = vmov 0   ;;  %s1107_s16 = smov 32  }
  0x15   :  { %892 = vmatprep.subr.bf16.mxu0 %v983_v1  ;;  %v39_v3 = vld [vmem:[#allocation2] sm:$0xff]  ;;  %903 = vmatpush3.bf16.msra.mxu1 %v1165_v2  ;;  %v48_v8 = vpack.c.bf16 %v42_v7, %v41_v5  ;;  %v1172_v9 = vld [vmem:[%s1339_s2 + $0x8] sm:$0xff]   ;;  %v149_v26 = vand.u32 127, %v148_v24  ;;  %vm165_vm5 = vcmask 261120   ;;  %v45_v60 = vld [vmem:[#allocation2 + $0x30] sm:$0xff]  ;;  %s1108_s23 = smov [#allocation5]  }
  0x16   :  { %893 = vmatpush3.bf16.msra.mxu0 %v983_v1  ;;  %v47_v6 = vpack.c.bf16 %v40_v4, %v39_v3  ;;  %904 = vmatprep.subr.bf16.mxu1 %v1103_v0  ;;  %v1192_v11 = vld [vmem:[%s1340_s3] ss:$0 sm:$0xff]  ;;  %s1106_s3 = smov 64   ;;  %v44_v59 = vld [vmem:[#allocation2 + $0x28] sm:$0xff]  ;;  %v46_v62 = vld [vmem:[#allocation2 + $0x38] sm:$0xff]  ;;  %vm816_vm6 = vcmask 179200  }
  0x17   :  { %918 = vmatprep.subr.bf16.mxu0 %v1103_v0  ;;  %vm150_vm2 = vcmp.ge.s32.totalorder %v149_v26, 64  ;;  %vm151_vm3 = vcmp.lt.s32.totalorder %v149_v26, 96  ;;  %v43_v58 = vld [vmem:[#allocation2 + $0x20] sm:$0xff]  ;;  %v50_v63 = vpack.c.bf16 %v46_v62, %v45_v60  ;;  %v987_v27 = vld [vmem:[%s1341_s4 + $0x8] sm:$0xff]  }
  0x18   :  { %894 = vmatprep.mubr.msk.bf16.mxu0 %vm66_vm1, %v47_v6  ;;  %vm1199_vm4 = vmand %vm150_vm2, %vm151_vm3  ;;  %v49_v61 = vpack.c.bf16 %v44_v59, %v43_v58 }
  0x19   :  { %895 = vmatmul.mubr.msk.bf16.vlgmr.msra.gmra.mrb[0].mxu0 %vm66_vm1, %v48_v8  ;;  %905 = vmatpush3.bf16.msra.mxu1 %v1172_v9 }
  0x1a   :  { %919 = vmatpush3.bf16.msra.mxu0 %v1165_v2  ;;  %910 = vmatprep.subr.bf16.mxu1 %v1103_v0 }
  0x1b   :  { %920 = vmatprep.subr.bf16.mxu0 %v1103_v0  ;;  %898 = vmatprep.mubr.msk.bf16.mxu0 %vm66_vm1, %v49_v61 }
  0x1c   :  { %907 = vmatmul.mubr.bf16.vlgmr.msra.gmra.mrb[0].mxu1 %v1105_v10 }
  0x1d   :  { %911 = vmatpush3.bf16.msra.mxu1 %v1165_v2  ;;  %914 = vmatprep.mubr.msk.bf16.mxu1 %vm1104_vm0, %v1103_v0 }
  0x1e   :  { %912 = vmatprep.subr.bf16.mxu1 %v1103_v0  ;;  %921 = vmatpush3.bf16.msra.mxu0 %v1172_v9 }
  0x1f   :  { %934 = vmatprep.subr.bf16.mxu0 %v1103_v0 }
  0x21   :  { %913 = vmatpush3.bf16.msra.mxu1 %v1172_v9  ;;  %899 = vmatmul.mubr.msk.bf16.gmra.mrb[4].mxu0 %vm66_vm1, %v50_v63 }
  0x22   :  { %926 = vmatprep.subr.bf16.mxu1 %v1103_v0  ;;  %922 = vmatprep.mubr.msk.bf16.mxu0 %vm1104_vm0, %v1103_v0 }
  0xec   :  { %v1194_v12 = vpop.f32.mrb[0].mxu0 }
  0xed   :  { %v113_v13 = vpop.f32.mrb[1].mxu0 }
  0xee   :  { %v114_v14 = vadd.f32 %v1192_v11, %v113_v13  ;;  %v1197_v15 = vpop.f32.mrb[2].mxu0 }
  0xef   :  { %v116_v16 = vpop.f32.mrb[3].mxu0  ;;  %v203_v17 = vpop.f32.mrb[0].mxu1 }
  0xf0   :  { %v209_v18 = vadd.f32 %v203_v17, %v114_v14  ;;  %v908_v19 = vpop.f32.mrb[1].mxu1  ;;  %v117_v41 = vadd.f32 %v1192_v11, %v116_v16  ;;  %v122_v14 = vadd.f32 %v1194_v12, %v1192_v11 }
  0xf1   :  { %v206_v20 = vpop.f32.mrb[2].mxu1 }
  0xf2   :  { %v841_v21 = vmul.f32 -1.442695, %v209_v18  ;;  %v909_v22 = vpop.f32.mrb[3].mxu1 }
  0xf4   :  { %988 = vpow2.f32 %v841_v21  ;;  %v1227_v6 = vpop.f32.mrb[4].mxu0 }
  0xf5   :  { %990 = vtanh.f32 %v209_v18  ;;  %v1229_v7 = vpop.f32.mrb[5].mxu0 }
  0xf6   :  { %v1231_v8 = vpop.f32.mrb[6].mxu0  ;;  %v130_v58 = vadd.f32 %v1192_v11, %v1229_v7 }
  0xf7   :  { %v1233_v10 = vpop.f32.mrb[7].mxu0 }
  0xfe   :  { %v989_v23 = vpop.eup %988 }
  0xff   :  { %v214_v25 = vadd.f32 1.0, %v989_v23  ;;  %v991_v28 = vpop.eup %990 }
 0x101   :  { %992 = vrcp.f32 %v214_v25 }
 0x10b   :  { %v993_v29 = vpop.eup %992 }
 0x10c   :  { %v217_v30 = vsel %vm1199_vm4, %v991_v28, %v993_v29 }
 0x10d   :  { %220 = vrot.lane.b32.xlu0 %v217_v30, %s1106_s3  ;;  %v218_v33 = vmul.f32 0.0, %v217_v30 }
 0x17f   :  { %v221_v31 = vpop.permute.xlu0 %220 }
 0x180   :  { %v223_v32 = vmul.f32 %v221_v31, %v217_v30 }
 0x182   :  { %225 = vrot.lane.b32.xlu0 %v223_v32, %s1107_s16 }
 0x1f4   :  { %v226_v34 = vpop.permute.xlu0 %225 }
 0x1f5   :  { %v228_v35 = vadd.f32 %v226_v34, %v218_v33 }
 0x1f7   :  { %994 = vtanh.f32 %v228_v35 }
 0x201   :  { %v995_v36 = vpop.eup %994 }
 0x202   :  { %231 = vrot.lane.b32.xlu1 %v995_v36, %s1106_s3 }
 0x274   :  { %v232_v37 = vpop.permute.xlu1 %231 }
 0x275   :  { %v234_v38 = vmul.f32 %v232_v37, %v217_v30  ;;  %v125_v37 = vadd.f32 %v1197_v15, %v1192_v11 }
 0x277   :  { %v235_v39 = vpack.c.bf16 %v234_v38, %v234_v38 }
 0x279   :  { %237 = vrot.lane.b32.xlu1 %v235_v39, %s1107_s16 }
 0x2eb   :  { %v238_v40 = vpop.permute.xlu1 %237 }
 0x2ec   :  { %915 = vmatmul.mubr.msk.bf16.vlgmr.msra.gmra.mrb[4].mxu1 %vm165_vm5, %v238_v40 }
 0x2ed   :  { %927 = vmatpush3.bf16.msra.mxu1 %v1165_v2  ;;  %930 = vmatprep.mubr.msk.bf16.mxu1 %vm1104_vm0, %v1103_v0 }
 0x2ee   :  { %928 = vmatprep.subr.bf16.mxu1 %v1103_v0 }
 0x2f1   :  { %929 = vmatpush3.bf16.msra.mxu1 %v1172_v9 }
 0x2f2   :  { %942 = vmatprep.subr.bf16.mxu1 %v1103_v0 }
 0x3bf   :  { %v276_v42 = vpop.f32.mrb[4].mxu1 }
 0x3c0   :  { %v282_v43 = vadd.f32 %v276_v42, %v117_v41  ;;  %v916_v44 = vpop.f32.mrb[5].mxu1 }
 0x3c1   :  { %v279_v45 = vpop.f32.mrb[6].mxu1 }
 0x3c2   :  { %v843_v46 = vmul.f32 -1.442695, %v282_v43  ;;  %v917_v47 = vpop.f32.mrb[7].mxu1 }
 0x3c4   :  { %996 = vpow2.f32 %v843_v46 }
 0x3c5   :  { %998 = vtanh.f32 %v282_v43 }
 0x3ce   :  { %v997_v48 = vpop.eup %996 }
 0x3cf   :  { %v287_v49 = vadd.f32 1.0, %v997_v48  ;;  %v999_v50 = vpop.eup %998 }
 0x3d1   :  { %1000 = vrcp.f32 %v287_v49 }
 0x3db   :  { %v1001_v51 = vpop.eup %1000 }
 0x3dc   :  { %v290_v52 = vsel %vm1199_vm4, %v999_v50, %v1001_v51 }
 0x3dd   :  { %293 = vrot.lane.b32.xlu0 %v290_v52, %s1106_s3  ;;  %v291_v55 = vmul.f32 %v290_v52, %v228_v35 }
 0x44f   :  { %v294_v53 = vpop.permute.xlu0 %293 }
 0x450   :  { %v296_v54 = vmul.f32 %v294_v53, %v290_v52 }
 0x452   :  { %298 = vrot.lane.b32.xlu1 %v296_v54, %s1107_s16 }
 0x4c4   :  { %v299_v56 = vpop.permute.xlu1 %298 }
 0x4c5   :  { %v301_v57 = vadd.f32 %v299_v56, %v291_v55 }
 0x4c7   :  { %1002 = vtanh.f32 %v301_v57 }
 0x4d1   :  { %v1003_v1 = vpop.eup %1002 }
 0x4d2   :  { %304 = vrot.lane.b32.xlu0 %v1003_v1, %s1106_s3 }
 0x544   :  { %v305_v3 = vpop.permute.xlu0 %304 }
 0x545   :  { %v307_v4 = vmul.f32 %v305_v3, %v290_v52 }
 0x547   :  { %v308_v5 = vpack.c.bf16 %v307_v4, %v307_v4 }
 0x549   :  { %310 = vrot.lane.b32.xlu1 %v308_v5, %s1107_s16 }
 0x5bb   :  { %v311_v13 = vpop.permute.xlu1 %310 }
 0x5bc   :  { %923 = vmatmul.mubr.msk.bf16.vlgmr.msra.gmra.mrb[8].mxu0 %vm165_vm5, %v311_v13 }
 0x5bd   :  { %935 = vmatpush3.bf16.msra.mxu0 %v1165_v2  ;;  %938 = vmatprep.mubr.msk.bf16.mxu0 %vm1104_vm0, %v1103_v0 }
 0x5be   :  { %936 = vmatprep.subr.bf16.mxu0 %v1103_v0 }
 0x5c1   :  { %937 = vmatpush3.bf16.msra.mxu0 %v1172_v9 }
 0x5c2   :  { %950 = vmatprep.subr.bf16.mxu0 %v1103_v0 }
 0x68f   :  { %v349_v16 = vpop.f32.mrb[8].mxu0 }
 0x690   :  { %v355_v17 = vadd.f32 %v349_v16, %v122_v14  ;;  %v924_v18 = vpop.f32.mrb[9].mxu0 }
 0x691   :  { %v352_v19 = vpop.f32.mrb[10].mxu0 }
 0x692   :  { %v845_v20 = vmul.f32 -1.442695, %v355_v17  ;;  %v925_v21 = vpop.f32.mrb[11].mxu0 }
 0x694   :  { %1004 = vpow2.f32 %v845_v20 }
 0x695   :  { %1006 = vtanh.f32 %v355_v17 }
 0x69e   :  { %v1005_v22 = vpop.eup %1004 }
 0x69f   :  { %v360_v23 = vadd.f32 1.0, %v1005_v22  ;;  %v1007_v24 = vpop.eup %1006 }
 0x6a1   :  { %1008 = vrcp.f32 %v360_v23 }
 0x6ab   :  { %v1009_v25 = vpop.eup %1008 }
 0x6ac   :  { %v363_v26 = vsel %vm1199_vm4, %v1007_v24, %v1009_v25  ;;  %v133_v25 = vadd.f32 %v1192_v11, %v1233_v10 }
 0x6ad   :  { %366 = vrot.lane.b32.xlu0 %v363_v26, %s1106_s3  ;;  %v364_v29 = vmul.f32 %v363_v26, %v301_v57 }
 0x71f   :  { %v367_v28 = vpop.permute.xlu0 %366 }
 0x720   :  { %v369_v12 = vmul.f32 %v367_v28, %v363_v26 }
 0x722   :  { %371 = vrot.lane.b32.xlu1 %v369_v12, %s1107_s16 }
 0x794   :  { %v372_v30 = vpop.permute.xlu1 %371 }
 0x795   :  { %v374_v31 = vadd.f32 %v372_v30, %v364_v29 }
 0x797   :  { %1010 = vtanh.f32 %v374_v31 }
 0x7a1   :  { %v1011_v32 = vpop.eup %1010 }
 0x7a2   :  { %377 = vrot.lane.b32.xlu0 %v1011_v32, %s1106_s3 }
 0x814   :  { %v378_v33 = vpop.permute.xlu0 %377 }
 0x815   :  { %v380_v34 = vmul.f32 %v378_v33, %v363_v26 }
 0x817   :  { %v381_v35 = vpack.c.bf16 %v380_v34, %v380_v34 }
 0x819   :  { %383 = vrot.lane.b32.xlu1 %v381_v35, %s1107_s16 }
 0x88b   :  { %v384_v36 = vpop.permute.xlu1 %383 }
 0x88c   :  { %931 = vmatmul.mubr.msk.bf16.vlgmr.msra.gmra.mrb[8].mxu1 %vm165_vm5, %v384_v36 }
 0x88d   :  { %943 = vmatpush3.bf16.msra.mxu1 %v1165_v2  ;;  %946 = vmatprep.mubr.msk.bf16.mxu1 %vm1104_vm0, %v1103_v0 }
 0x88e   :  { %944 = vmatprep.subr.bf16.mxu1 %v1103_v0 }
 0x891   :  { %945 = vmatpush3.bf16.msra.mxu1 %v1172_v9 }
 0x892   :  { %958 = vmatprep.subr.bf16.mxu1 %v1103_v0 }
 0x95f   :  { %v422_v38 = vpop.f32.mrb[8].mxu1 }
 0x960   :  { %v428_v39 = vadd.f32 %v422_v38, %v125_v37  ;;  %v932_v40 = vpop.f32.mrb[9].mxu1 }
 0x961   :  { %v425_v41 = vpop.f32.mrb[10].mxu1 }
 0x962   :  { %v847_v42 = vmul.f32 -1.442695, %v428_v39  ;;  %v933_v43 = vpop.f32.mrb[11].mxu1 }
 0x964   :  { %1012 = vpow2.f32 %v847_v42 }
 0x965   :  { %1014 = vtanh.f32 %v428_v39 }
 0x96e   :  { %v1013_v44 = vpop.eup %1012 }
 0x96f   :  { %v433_v45 = vadd.f32 1.0, %v1013_v44  ;;  %v1015_v46 = vpop.eup %1014  ;;  %v138_v44 = vadd.f32 %v1227_v6, %v1192_v11 }
 0x971   :  { %1016 = vrcp.f32 %v433_v45 }
 0x97b   :  { %v1017_v47 = vpop.eup %1016 }
 0x97c   :  { %v436_v48 = vsel %vm1199_vm4, %v1015_v46, %v1017_v47 }
 0x97d   :  { %439 = vrot.lane.b32.xlu0 %v436_v48, %s1106_s3  ;;  %v437_v50 = vmul.f32 %v436_v48, %v374_v31 }
 0x9ef   :  { %v440_v49 = vpop.permute.xlu0 %439 }
 0x9f0   :  { %v442_v15 = vmul.f32 %v440_v49, %v436_v48 }
 0x9f2   :  { %444 = vrot.lane.b32.xlu1 %v442_v15, %s1107_s16 }
 0xa64   :  { %v445_v51 = vpop.permute.xlu1 %444 }
 0xa65   :  { %v447_v52 = vadd.f32 %v445_v51, %v437_v50 }
 0xa67   :  { %1018 = vtanh.f32 %v447_v52 }
 0xa71   :  { %v1019_v53 = vpop.eup %1018 }
 0xa72   :  { %450 = vrot.lane.b32.xlu0 %v1019_v53, %s1106_s3 }
 0xae4   :  { %v451_v54 = vpop.permute.xlu0 %450 }
 0xae5   :  { %v453_v55 = vmul.f32 %v451_v54, %v436_v48 }
 0xae7   :  { %v454_v56 = vpack.c.bf16 %v453_v55, %v453_v55 }
 0xae9   :  { %456 = vrot.lane.b32.xlu1 %v454_v56, %s1107_s16 }
 0xb5b   :  { %v457_v57 = vpop.permute.xlu1 %456 }
 0xb5c   :  { %939 = vmatmul.mubr.msk.bf16.vlgmr.msra.gmra.mrb[12].mxu0 %vm165_vm5, %v457_v57 }
 0xb5d   :  { %951 = vmatpush3.bf16.msra.mxu0 %v1165_v2  ;;  %954 = vmatprep.mubr.msk.bf16.mxu0 %vm1104_vm0, %v1103_v0 }
 0xb5e   :  { %952 = vmatprep.subr.bf16.mxu0 %v1103_v0 }
 0xb61   :  { %953 = vmatpush3.bf16.msra.mxu0 %v1172_v9 }
 0xb62   :  { %966 = vmatprep.subr.bf16.mxu0 %v1103_v0 }
 0xc2f   :  { %v495_v59 = vpop.f32.mrb[12].mxu0 }
 0xc30   :  { %v501_v60 = vadd.f32 %v495_v59, %v130_v58  ;;  %v940_v61 = vpop.f32.mrb[13].mxu0 }
 0xc31   :  { %v498_v62 = vpop.f32.mrb[14].mxu0 }
 0xc32   :  { %v849_v63 = vmul.f32 -1.442695, %v501_v60  ;;  %v941_v1 = vpop.f32.mrb[15].mxu0 }
 0xc33   :  { %v141_v1 = vadd.f32 %v1231_v8, %v1192_v11 }
 0xc34   :  { %1020 = vpow2.f32 %v849_v63 }
 0xc35   :  { %1022 = vtanh.f32 %v501_v60 }
 0xc3e   :  { %v1021_v3 = vpop.eup %1020 }
 0xc3f   :  { %v506_v4 = vadd.f32 1.0, %v1021_v3  ;;  %v1023_v5 = vpop.eup %1022 }
 0xc41   :  { %1024 = vrcp.f32 %v506_v4 }
 0xc4b   :  { %v1025_v13 = vpop.eup %1024 }
 0xc4c   :  { %v509_v14 = vsel %vm1199_vm4, %v1023_v5, %v1025_v13 }
 0xc4d   :  { %512 = vrot.lane.b32.xlu0 %v509_v14, %s1106_s3  ;;  %v510_v17 = vmul.f32 %v509_v14, %v447_v52 }
 0xcbf   :  { %v513_v16 = vpop.permute.xlu0 %512 }
 0xcc0   :  { %v515_v7 = vmul.f32 %v513_v16, %v509_v14 }
 0xcc2   :  { %517 = vrot.lane.b32.xlu1 %v515_v7, %s1107_s16 }
 0xd34   :  { %v518_v18 = vpop.permute.xlu1 %517 }
 0xd35   :  { %v520_v19 = vadd.f32 %v518_v18, %v510_v17 }
 0xd37   :  { %1026 = vtanh.f32 %v520_v19 }
 0xd41   :  { %v1027_v20 = vpop.eup %1026 }
 0xd42   :  { %523 = vrot.lane.b32.xlu0 %v1027_v20, %s1106_s3 }
 0xdb4   :  { %v524_v21 = vpop.permute.xlu0 %523 }
 0xdb5   :  { %v526_v22 = vmul.f32 %v524_v21, %v509_v14 }
 0xdb7   :  { %v527_v23 = vpack.c.bf16 %v526_v22, %v526_v22 }
 0xdb9   :  { %529 = vrot.lane.b32.xlu1 %v527_v23, %s1107_s16 }
 0xe2b   :  { %v530_v24 = vpop.permute.xlu1 %529 }
 0xe2c   :  { %947 = vmatmul.mubr.msk.bf16.vlgmr.msra.gmra.mrb[12].mxu1 %vm165_vm5, %v530_v24  ;;  %v986_v24 = vld [vmem:[%s1341_s4] sm:$0xff]   ;;  %s824_s4 = sshll.u32 %s1108_s23, 4  ;;  %s825_s4 = int_to_ptr.vmem [resolvable:$true] %s824_s4 }
 0xe2d   :  { %959 = vmatpush3.bf16.msra.mxu1 %v1165_v2  ;;  %962 = vmatprep.mubr.msk.bf16.mxu1 %vm1104_vm0, %v1103_v0  ;;  %s1074_s24 = scalar_lea.vmem %s825_s4, 128  ;;  %p1079_p9 = scmp.lt.s32.totalorder %s825_s4, %s825_s4 }
 0xe2e   :  { %960 = vmatprep.subr.bf16.mxu1 %v1103_v0  ;;  %p1075_p8 = scmp.ne.s32.totalorder %s825_s4, %s1074_s24  ;;  %p1080_p10 = scmp.lt.s32.totalorder %s1074_s24, %s1074_s24 }
 0xe30   :  { %p1081_p11 = por %p1080_p10, %p1079_p9 }
 0xe31   :  { %961 = vmatpush3.bf16.msra.mxu1 %v1172_v9 }
 0xe32   :  { %p1082_p12 = pnand %p1081_p11, %p1075_p8 }
 0xeff   :  { %v568_v26 = vpop.f32.mrb[12].mxu1 }
 0xf00   :  { %v574_v28 = vadd.f32 %v568_v26, %v133_v25  ;;  %v948_v12 = vpop.f32.mrb[13].mxu1 }
 0xf01   :  { %v571_v29 = vpop.f32.mrb[14].mxu1 }
 0xf02   :  { %v851_v30 = vmul.f32 -1.442695, %v574_v28  ;;  %v949_v31 = vpop.f32.mrb[15].mxu1 }
 0xf04   :  { %1028 = vpow2.f32 %v851_v30  ;;  %v856_v30 = vld [vmem:[%s1342_s5] ss:$0 sm:$0xff] }
 0xf05   :  { %1030 = vtanh.f32 %v574_v28 }
 0xf0e   :  { %v1029_v32 = vpop.eup %1028 }
 0xf0f   :  { %v579_v33 = vadd.f32 1.0, %v1029_v32  ;;  %v1031_v2 = vpop.eup %1030 }
 0xf11   :  { %1032 = vrcp.f32 %v579_v33 }
 0xf1b   :  { %v1033_v34 = vpop.eup %1032 }
 0xf1c   :  { %v582_v35 = vsel %vm1199_vm4, %v1031_v2, %v1033_v34 }
 0xf1d   :  { %585 = vrot.lane.b32.xlu0 %v582_v35, %s1106_s3  ;;  %v583_v36 = vmul.f32 %v582_v35, %v520_v19 }
 0xf8f   :  { %v586_v9 = vpop.permute.xlu0 %585 }
 0xf90   :  { %v588_v10 = vmul.f32 %v586_v9, %v582_v35 }
 0xf92   :  { %590 = vrot.lane.b32.xlu1 %v588_v10, %s1107_s16 }
0x1004   :  { %v591_v37 = vpop.permute.xlu1 %590 }
0x1005   :  { %v593_v38 = vadd.f32 %v591_v37, %v583_v36 }
0x1007   :  { %1034 = vtanh.f32 %v593_v38 }
0x1011   :  { %v1035_v39 = vpop.eup %1034 }
0x1012   :  { %596 = vrot.lane.b32.xlu0 %v1035_v39, %s1106_s3 }
0x1084   :  { %v597_v40 = vpop.permute.xlu0 %596 }
0x1085   :  { %v599_v41 = vmul.f32 %v597_v40, %v582_v35 }
0x1087   :  { %v600_v42 = vpack.c.bf16 %v599_v41, %v599_v41 }
0x1089   :  { %602 = vrot.lane.b32.xlu1 %v600_v42, %s1107_s16 }
0x10fb   :  { %v603_v43 = vpop.permute.xlu1 %602 }
0x10fc   :  { %955 = vmatmul.mubr.msk.bf16.vlgmr.msra.gmra.mrb[16].mxu0 %vm165_vm5, %v603_v43 }
0x10fd   :  { %970 = vmatprep.mubr.msk.bf16.mxu0 %vm1104_vm0, %v1103_v0  ;;  %967 = vmatpush3.bf16.msra.mxu0 %v986_v24 }
0x10fe   :  { %968 = vmatprep.subr.bf16.mxu0 %v1103_v0 }
0x1101   :  { %969 = vmatpush3.bf16.msra.mxu0 %v987_v27 }
0x11cf   :  { %v641_v45 = vpop.f32.mrb[16].mxu0 }
0x11d0   :  { %v647_v46 = vadd.f32 %v641_v45, %v138_v44  ;;  %v956_v47 = vpop.f32.mrb[17].mxu0 }
0x11d1   :  { %v644_v48 = vpop.f32.mrb[18].mxu0 }
0x11d2   :  { %v853_v49 = vmul.f32 -1.442695, %v647_v46  ;;  %v957_v15 = vpop.f32.mrb[19].mxu0 }
0x11d4   :  { %1036 = vpow2.f32 %v853_v49 }
0x11d5   :  { %1038 = vtanh.f32 %v647_v46 }
0x11de   :  { %v1037_v50 = vpop.eup %1036 }
0x11df   :  { %v652_v51 = vadd.f32 1.0, %v1037_v50  ;;  %v1039_v52 = vpop.eup %1038 }
0x11e1   :  { %1040 = vrcp.f32 %v652_v51 }
0x11eb   :  { %v1041_v53 = vpop.eup %1040 }
0x11ec   :  { %v655_v54 = vsel %vm1199_vm4, %v1039_v52, %v1041_v53 }
0x11ed   :  { %658 = vrot.lane.b32.xlu0 %v655_v54, %s1106_s3  ;;  %v656_v56 = vmul.f32 %v655_v54, %v593_v38 }
0x125f   :  { %v659_v55 = vpop.permute.xlu0 %658 }
0x1260   :  { %v661_v6 = vmul.f32 %v659_v55, %v655_v54 }
0x1262   :  { %663 = vrot.lane.b32.xlu1 %v661_v6, %s1107_s16 }
0x12d4   :  { %v664_v57 = vpop.permute.xlu1 %663 }
0x12d5   :  { %v666_v58 = vadd.f32 %v664_v57, %v656_v56 }
0x12d7   :  { %1042 = vtanh.f32 %v666_v58 }
0x12e1   :  { %v1043_v59 = vpop.eup %1042 }
0x12e2   :  { %669 = vrot.lane.b32.xlu0 %v1043_v59, %s1106_s3 }
0x1354   :  { %v670_v60 = vpop.permute.xlu0 %669 }
0x1355   :  { %v672_v61 = vmul.f32 %v670_v60, %v655_v54 }
0x1357   :  { %v673_v62 = vpack.c.bf16 %v672_v61, %v672_v61 }
0x1359   :  { %675 = vrot.lane.b32.xlu1 %v673_v62, %s1107_s16 }
0x13cb   :  { %v676_v63 = vpop.permute.xlu1 %675 }
0x13cc   :  { %963 = vmatmul.mubr.msk.bf16.vlgmr.msra.gmra.mrb[16].mxu1 %vm165_vm5, %v676_v63 }
0x149f   :  { %v714_v3 = vpop.f32.mrb[16].mxu1 }
0x14a0   :  { %v720_v4 = vadd.f32 %v714_v3, %v141_v1  ;;  %v964_v5 = vpop.f32.mrb[17].mxu1 }
0x14a1   :  { %v717_v13 = vpop.f32.mrb[18].mxu1 }
0x14a2   :  { %v855_v14 = vmul.f32 -1.442695, %v720_v4  ;;  %v965_v16 = vpop.f32.mrb[19].mxu1 }
0x14a4   :  { %1044 = vpow2.f32 %v855_v14 }
0x14a5   :  { %1046 = vtanh.f32 %v720_v4 }
0x14ae   :  { %v1045_v7 = vpop.eup %1044 }
0x14af   :  { %v725_v17 = vadd.f32 1.0, %v1045_v7  ;;  %v1047_v18 = vpop.eup %1046 }
0x14b1   :  { %1048 = vrcp.f32 %v725_v17 }
0x14bb   :  { %v1049_v19 = vpop.eup %1048 }
0x14bc   :  { %v728_v20 = vsel %vm1199_vm4, %v1047_v18, %v1049_v19 }
0x14bd   :  { %731 = vrot.lane.b32.xlu0 %v728_v20, %s1106_s3  ;;  %v729_v8 = vmul.f32 %v728_v20, %v666_v58 }
0x152f   :  { %v732_v21 = vpop.permute.xlu0 %731 }
0x1530   :  { %v734_v11 = vmul.f32 %v732_v21, %v728_v20 }
0x1532   :  { %736 = vrot.lane.b32.xlu1 %v734_v11, %s1107_s16 }
0x15a4   :  { %v737_v22 = vpop.permute.xlu1 %736 }
0x15a5   :  { %v739_v23 = vadd.f32 %v737_v22, %v729_v8 }
0x15a7   :  { %1050 = vtanh.f32 %v739_v23 }
0x15b1   :  { %v1051_v25 = vpop.eup %1050 }
0x15b2   :  { %742 = vrot.lane.b32.xlu0 %v1051_v25, %s1106_s3 }
0x1624   :  { %v743_v26 = vpop.permute.xlu0 %742 }
0x1625   :  { %v745_v28 = vmul.f32 %v743_v26, %v728_v20 }
0x1627   :  { %v746_v12 = vpack.c.bf16 %v745_v28, %v745_v28 }
0x1629   :  { %759 = vrot.lane.b32.xlu1 %v746_v12, %s1107_s16 }
0x169b   :  { %v760_v29 = vpop.permute.xlu1 %759 }
0x169c   :  { %971 = vmatmul.mubr.msk.bf16.vlgmr.msra.gmra.mrb[20].mxu0 %vm165_vm5, %v760_v29 }
0x176f   :  { %v810_v31 = vpop.f32.mrb[20].mxu0 }
0x1770   :  { %v811_v0 = vadd.f32 %v856_v30, %v810_v31  ;;  %v972_v32 = vpop.f32.mrb[21].mxu0 }
0x1771   :  { %v813_v33 = vpop.f32.mrb[22].mxu0 }
0x1772   :  { %v973_v2 = vpop.f32.mrb[23].mxu0  ;;  %817 = vst.msk [vmem:[#allocation5] sm:$0xff] %vm816_vm6, %v811_v0 }
0x1773   :  { %1085 = shalt.err (!%p1082_p12)
}
0x1774   :  { %s1086_s5 = scalar_lea.hbm %s1343_s6, 128 }
0x1775   :  { %p1087_p13 = scmp.ne.s32.totalorder %s1343_s6, %s1086_s5  ;;  %p1090_p0 = scmp.lt.u32.totalorder %s1086_s5, %s1343_s6 }
0x1777   :  { %p1092_p1 = pnand %p1090_p0, %p1087_p13 }
0x1779   :  { %1095 = shalt.err (!%p1092_p1)
}
0x177a   :  { %827 = dma.vmem_to_hbm [thread:$0]  %s825_s4, 128, %s1343_s6, [#allocation4]  }
0x177b   :  { %1098 = dma.done.wait [#allocation4], 128  }
0x177c   :  { %1099 = vsyncadd [#allocation4], 4294967168 }
0x177d   :  { %831 = vsyncpa [#allocation3], 1 }
0x177e   :  { %832 = vsyncpa [#allocation4], 1 }

</bundles_post_ra>
